<compile_context>
chip_gen: v6e
topology: v6e:2x2x1
jax: 0.10.0
libtpu: 0.0.40
codegen_flags: <defaults>
</compile_context>

<pallas_src>
import functools

import jax
import jax.numpy as jnp
from jax import lax
from jax.experimental import pallas as pl
from jax.experimental.pallas import tpu as pltpu

F32 = jnp.float32
BF16 = jnp.bfloat16
LANE = 128


def _round_up(v, m):
    return ((v + m - 1) // m) * m


def _pick_tile(n, cap=4096):
    return min(_round_up(n, LANE), cap)


# --------------------------------------------------------------------------
# Kernels
# --------------------------------------------------------------------------
def _cam_energy_softmax_kernel(g_ref, x_ref, att_ref, *, n_total, tn, mask_tail):
    """Pass 1: accumulate energy = x @ x^T over N tiles, finalize gamma*softmax.

    g_ref   : (1, 1) SMEM scalar gamma
    x_ref   : (C, TN) lane-dense tile of the flattened volume (f32)
    att_ref : (C, C)  output block, resident across the reduction axis (axis 1)
    """
    j = pl.program_id(1)
    nt = pl.num_programs(1)

    @pl.when(j == 0)
    def _init():
        att_ref[...] = jnp.zeros_like(att_ref)

    xt = x_ref[...]                                            # (C, TN) f32
    if mask_tail:
        # Ragged last tile: zero columns >= N so they contribute nothing to
        # the energy matrix.  (For full tiles the predicate is all-true and
        # the select is negligible VPU filler under a DMA-bound loop.)
        col = j * tn + lax.broadcasted_iota(jnp.int32, xt.shape, 1)
        xt = jnp.where(col < n_total, xt, 0.0)
    xb = xt.astype(BF16)                                       # bf16 MXU operands
    att_ref[...] += lax.dot_general(                           # (C, C) partial, f32 acc
        xb, xb, (((1,), (1,)), ((), ())),
        preferred_element_type=jnp.float32)

    @pl.when(j == nt - 1)
    def _finalize():
        energy = att_ref[...]
        en = jnp.max(energy, axis=-1, keepdims=True) - energy  # CAM "energy_new"
        e = jnp.exp(en - jnp.max(en, axis=-1, keepdims=True))  # stable softmax
        att_ref[...] = g_ref[0, 0] * (e / jnp.sum(e, axis=-1, keepdims=True))


def _cam_apply_kernel(att_ref, x_ref, o_ref):
    """Pass 2: o = (gamma*attention) @ x_tile + x_tile   (gamma pre-folded).

    att_ref : (C, C), x_ref / o_ref : (C, TN).
    Ragged tail lanes of the last tile need no mask: matmul columns are
    independent and out-of-bounds lanes are discarded by the masked store.
    """
    xt = x_ref[...]
    out = jnp.dot(att_ref[...].astype(BF16), xt.astype(BF16),
                  preferred_element_type=jnp.float32)
    o_ref[...] = out + xt


def _cam_fused_kernel(g_ref, x_ref, o_ref, *, n_total, mask_tail):
    """Single-pass variant: whole (C, N_aligned) per-batch slab resident in VMEM."""
    xt = x_ref[...]                                            # (C, NA) f32
    if mask_tail:
        col = lax.broadcasted_iota(jnp.int32, xt.shape, 1)
        xt = jnp.where(col < n_total, xt, 0.0)
    xb = xt.astype(BF16)
    energy = lax.dot_general(xb, xb, (((1,), (1,)), ((), ())),
                             preferred_element_type=jnp.float32)   # (C, C)
    en = jnp.max(energy, axis=-1, keepdims=True) - energy
    e = jnp.exp(en - jnp.max(en, axis=-1, keepdims=True))
    att = g_ref[0, 0] * (e / jnp.sum(e, axis=-1, keepdims=True))   # gamma folded
    out = jnp.dot(att.astype(BF16), xb, preferred_element_type=jnp.float32)
    o_ref[...] = out + xt


# --------------------------------------------------------------------------
# Wrapper
# --------------------------------------------------------------------------
def cam_forward(x, gamma, *, tn=None, force_two_pass=False,
                fused_vmem_budget_bytes=12 * 1024 * 1024):
    """CAM forward.  x: (B, C, H, W, Z) float32 (torch layout), gamma: scalar/(1,)."""
    B, C, H, W, Z = x.shape
    N = H * W * Z
    xf = x.reshape(B, C, N).astype(F32)          # metadata reshape, no HBM copy
    g2 = jnp.asarray(gamma, F32).reshape(1, 1)
    gamma_spec = pl.BlockSpec(memory_space=pltpu.MemorySpace.SMEM)

    npad = _round_up(N, LANE)

    # ---- fused single-pass path (one read + one write of x) ----------------
    # footprint ~ double-buffered f32 in/out slabs + bf16/f32 temporaries.
    fused_bytes = 6 * C * npad * 4
    if not force_two_pass and fused_bytes <= fused_vmem_budget_bytes:
        kern = functools.partial(_cam_fused_kernel,
                                 n_total=N, mask_tail=(npad != N))
        yf = pl.pallas_call(
            kern,
            out_shape=jax.ShapeDtypeStruct((B, C, N), F32),
            grid=(B,),
            in_specs=[gamma_spec,
                      pl.BlockSpec((None, C, npad), lambda b: (b, 0, 0))],
            out_specs=pl.BlockSpec((None, C, npad), lambda b: (b, 0, 0)),
            compiler_params=pltpu.CompilerParams(
                dimension_semantics=("parallel",)),
            cost_estimate=pl.CostEstimate(
                flops=4 * B * C * C * N,
                transcendentals=B * C * C,
                bytes_accessed=2 * B * C * N * 4 + B * C * C * 4),
        )(g2, xf)
        return yf.reshape(B, C, H, W, Z)

    # ---- two-pass streaming path -------------------------------------------
    tn = _pick_tile(N) if tn is None else _round_up(int(tn), LANE)
    nt = pl.cdiv(N, tn)
    mask_tail = (N % tn) != 0

    # pass 1: energy accumulation + softmax -> gamma * attention  (B, C, C)
    att = pl.pallas_call(
        functools.partial(_cam_energy_softmax_kernel,
                          n_total=N, tn=tn, mask_tail=mask_tail),
        out_shape=jax.ShapeDtypeStruct((B, C, C), F32),
        grid=(B, nt),
        in_specs=[gamma_spec,
                  pl.BlockSpec((None, C, tn), lambda b, j: (b, 0, j))],
        out_specs=pl.BlockSpec((None, C, C), lambda b, j: (b, 0, 0)),
        compiler_params=pltpu.CompilerParams(
            dimension_semantics=("parallel", "arbitrary")),
        cost_estimate=pl.CostEstimate(
            flops=2 * B * C * C * N,
            transcendentals=B * C * C,
            bytes_accessed=B * C * N * 4 + B * C * C * 4),
    )(g2, xf)

    # pass 2: out = (gamma * attention) @ x + x
    yf = pl.pallas_call(
        _cam_apply_kernel,
        out_shape=jax.ShapeDtypeStruct((B, C, N), F32),
        grid=(B, nt),
        in_specs=[pl.BlockSpec((None, C, C), lambda b, j: (b, 0, 0)),
                  pl.BlockSpec((None, C, tn), lambda b, j: (b, 0, j))],
        out_specs=pl.BlockSpec((None, C, tn), lambda b, j: (b, 0, j)),
        compiler_params=pltpu.CompilerParams(
            dimension_semantics=("parallel", "parallel")),
        cost_estimate=pl.CostEstimate(
            flops=2 * B * C * C * N,
            transcendentals=0,
            bytes_accessed=2 * B * C * N * 4 + B * C * C * 4),
    )(att, xf)

    return yf.reshape(B, C, H, W, Z)


# --------------------------------------------------------------------------
# Pure-JAX reference (mirrors the PyTorch CAM.forward line by line)
# --------------------------------------------------------------------------
def cam_reference(x, gamma):
    B, C = x.shape[0], x.shape[1]
    xf = x.reshape(B, C, -1).astype(F32)
    energy = jnp.einsum("bcn,bdn->bcd", xf, xf)
    energy_new = jnp.max(energy, axis=-1, keepdims=True) - energy
    attention = jax.nn.softmax(energy_new, axis=-1)
    out = jnp.einsum("bcd,bdn->bcn", attention, xf)
    return jnp.asarray(gamma, F32) * out.reshape(x.shape) + x


# --------------------------------------------------------------------------
if __name__ == "__main__":
    key = jax.random.PRNGKey(0)

    # Small volume consistent with the module: B x C x H x W x Z.
    # N = 960 is deliberately NOT a multiple of 128 so the ragged-tail masking
    # paths are exercised.
    B, C, H, W, Z = 2, 64, 8, 10, 12
    x = 0.1 * jax.random.normal(key, (B, C, H, W, Z), F32)
    # torch initializes gamma to zero (out == x); use a nonzero value so the
    # attention path is actually exercised.
    gamma = jnp.asarray([0.7], F32)

    ref = cam_reference(x, gamma)

    # Fused single-pass path (default choice at this size).
    fused = jax.jit(cam_forward)
    out_f = jax.block_until_ready(fused(x, gamma))
    assert out_f.shape == x.shape, out_f.shape
    assert bool(jnp.all(jnp.isfinite(out_f))), "non-finite output (fused)"
    err_f = float(jnp.max(jnp.abs(out_f - ref)))
    assert err_f < 2e-3, f"fused path mismatch vs reference: {err_f}"

    # Two-pass streaming path with a small tile: exercises the resident (C,C)
    # accumulator across 4 reduction steps and the ragged-tail mask.
    twopass = jax.jit(functools.partial(cam_forward, force_two_pass=True, tn=256))
    out_t = jax.block_until_ready(twopass(x, gamma))
    assert out_t.shape == x.shape, out_t.shape
    assert bool(jnp.all(jnp.isfinite(out_t))), "non-finite output (two-pass)"
    err_t = float(jnp.max(jnp.abs(out_t - ref)))
    assert err_t < 2e-3, f"two-pass path mismatch vs reference: {err_t}"

    # gamma == 0 (the torch init): output must equal the input.
    out_0 = jax.block_until_ready(fused(x, jnp.zeros((1,), F32)))
    assert float(jnp.max(jnp.abs(out_0 - x))) < 1e-6, "gamma=0 identity failed"

    print("KERNEL_OK")
</pallas_src>

<mosaic_0001>
module attributes {stable_mosaic.version = 11 : i64} {
  func.func @_cam_fused_kernel(%arg0: i32, %arg1: memref<1x1xf32, #tpu.memory_space<smem>>, %arg2: memref<1x64x1024xf32, #tpu.memory_space<vmem>>, %arg3: memref<1x64x1024xf32, #tpu.memory_space<vmem>>) attributes {dimension_semantics = [#tpu.dimension_semantics<parallel>], iteration_bounds = array<i64: 2>, scalar_prefetch = 0 : i64, scratch_operands = 0 : i64, tpu.core_type = #tpu.core_type<tc>, window_params = [{transform_indices = @transform_0, window_bounds = array<i64: 1, 1>}, {transform_indices = @transform_1, window_bounds = array<i64: 1, 64, 1024>}, {transform_indices = @transform_2, window_bounds = array<i64: 1, 64, 1024>}]} {
    %c0 = arith.constant 0 : index
    %c0_0 = arith.constant 0 : index
    %c0_1 = arith.constant 0 : index
    %0 = vector.load %arg2[%c0, %c0_0, %c0_1] : memref<1x64x1024xf32, #tpu.memory_space<vmem>>, vector<1x64x1024xf32>
    %1 = vector.shape_cast %0 : vector<1x64x1024xf32> to vector<64x1024xf32>
    %2 = tpu.iota {dimensions = array<i32: 1>} : vector<64x1024xi32>
    %c960_i32 = arith.constant 960 : i32
    %3 = vector.broadcast %c960_i32 : i32 to vector<64x1024xi32>
    %4 = arith.cmpi slt, %2, %3 : vector<64x1024xi32>
    %cst = arith.constant 0.000000e+00 : f32
    %5 = vector.broadcast %cst : f32 to vector<64x1024xf32>
    %6 = arith.select %4, %1, %5 : vector<64x1024xi1>, vector<64x1024xf32>
    %7 = arith.truncf %6 : vector<64x1024xf32> to vector<64x1024xbf16>
    %cst_2 = arith.constant dense<0.000000e+00> : vector<64x64xf32>
    %8 = tpu.matmul %7, %7, %cst_2 {dimension_numbers = #tpu.dot_dimension_numbers<[1], [1], [0], [0], [0, 0, 1, 0], [], []>} : vector<64x1024xbf16>, vector<64x1024xbf16>, vector<64x64xf32> -> vector<64x64xf32>
    %cst_3 = arith.constant dense<0xFF800000> : vector<64xf32>
    %9 = vector.multi_reduction <maximumf>, %8, %cst_3 [1] : vector<64x64xf32> to vector<64xf32>
    %10 = vector.shape_cast %9 : vector<64xf32> to vector<64x1xf32>
    %11 = vector.broadcast %10 : vector<64x1xf32> to vector<64x64xf32>
    %12 = arith.subf %11, %8 : vector<64x64xf32>
    %cst_4 = arith.constant dense<0xFF800000> : vector<64xf32>
    %13 = vector.multi_reduction <maximumf>, %12, %cst_4 [1] : vector<64x64xf32> to vector<64xf32>
    %14 = vector.shape_cast %13 : vector<64xf32> to vector<64x1xf32>
    %15 = vector.broadcast %14 : vector<64x1xf32> to vector<64x64xf32>
    %16 = arith.subf %12, %15 : vector<64x64xf32>
    %17 = math.exp %16 : vector<64x64xf32>
    %c0_5 = arith.constant 0 : index
    %c0_6 = arith.constant 0 : index
    %18 = memref.load %arg1[%c0_5, %c0_6] : memref<1x1xf32, #tpu.memory_space<smem>>
    %cst_7 = arith.constant dense<0.000000e+00> : vector<64xf32>
    %19 = vector.multi_reduction <add>, %17, %cst_7 [1] : vector<64x64xf32> to vector<64xf32>
    %20 = vector.shape_cast %19 : vector<64xf32> to vector<64x1xf32>
    %21 = vector.broadcast %20 : vector<64x1xf32> to vector<64x64xf32>
    %22 = arith.divf %17, %21 : vector<64x64xf32>
    %23 = vector.broadcast %18 : f32 to vector<64x64xf32>
    %24 = arith.mulf %23, %22 : vector<64x64xf32>
    %25 = arith.truncf %24 : vector<64x64xf32> to vector<64x64xbf16>
    %cst_8 = arith.constant dense<0.000000e+00> : vector<64x1024xf32>
    %26 = tpu.matmul %25, %7, %cst_8 {dimension_numbers = #tpu.dot_dimension_numbers<[1], [0], [0], [1], [0, 0, 1, 1], [], []>} : vector<64x64xbf16>, vector<64x1024xbf16>, vector<64x1024xf32> -> vector<64x1024xf32>
    %27 = arith.addf %26, %6 : vector<64x1024xf32>
    %c0_9 = arith.constant 0 : index
    %c0_10 = arith.constant 0 : index
    %c0_11 = arith.constant 0 : index
    %28 = vector.load %arg3[%c0_9, %c0_10, %c0_11] : memref<1x64x1024xf32, #tpu.memory_space<vmem>>, vector<1x64x1024xf32>
    %29 = vector.shape_cast %28 : vector<1x64x1024xf32> to vector<64x1024xf32>
    %30 = vector.shape_cast %27 : vector<64x1024xf32> to vector<1x64x1024xf32>
    tpu.vector_store %arg3[%c0_9, %c0_10, %c0_11], %30 {strides = array<i32>} : memref<1x64x1024xf32, #tpu.memory_space<vmem>>, vector<1x64x1024xf32>,
    return
  }
  func.func @transform_0(%arg0: i32) -> (i32, i32) {
    %c0_i32 = arith.constant 0 : i32
    %c0_i32_0 = arith.constant 0 : i32
    %c0_i32_1 = arith.constant 0 : i32
    return %c0_i32, %c0_i32_0 : i32, i32
  }
  func.func @transform_1(%arg0: i32) -> (i32, i32, i32) {
    %c0_i32 = arith.constant 0 : i32
    %c0_i32_0 = arith.constant 0 : i32
    %c0_i32_1 = arith.constant 0 : i32
    return %arg0, %c0_i32, %c0_i32_0 : i32, i32, i32
  }
  func.func @transform_2(%arg0: i32) -> (i32, i32, i32) {
    %c0_i32 = arith.constant 0 : i32
    %c0_i32_0 = arith.constant 0 : i32
    %c0_i32_1 = arith.constant 0 : i32
    return %arg0, %c0_i32, %c0_i32_0 : i32, i32, i32
  }
}

</mosaic_0001>

<bundles_post_ra>
// kernel: cam_forward.1
= control target key start
LH: loop header
LB: loop body
LE: loop exit
PB: predicated region body
PF: predicated region fallthrough
CT: control target
= control target key end

     0   :  { %s1302_s11 = smov 0   ;;  %s1918_s0 = inlined_call_operand.<no memory space> [shape: f32[1,1], index: 0, kind: input, shape index: {}]   ;;  %s1919_s1 = inlined_call_operand.vmem [shape: f32[2,64,960], index: 1, kind: input, shape index: {}]   ;;  %s1920_s2 = inlined_call_operand.vmem [shape: f32[2,64,960], index: 2, kind: output, shape index: {}]  }
   0x1   :  { %7 = sst [smem:[#allocation2]] %s1918_s0 }
   0x2 LB: > { %s1141_s12 = sadd.s32 4294967295, %s1281_s11   ;;  %p1145_p0 = scmp.ge.s32.totalorder %s1281_s11, 1  ;;  %s1281_s11 = sphi %s1302_s11, %s13_s11  }
   0x3   : > { %p113_p1 = scmp.lt.s32.totalorder %s1281_s11, 3 }
   0x5   : > { %p114_p2 = pnand %p1145_p0, %p113_p1 }
   0x7   : > { %117 = sbr.rel (%p114_p2) target bundleno = 1001 (0x3e9), region = 28 }
   0xc   : > { %p135_p3 = scmp.lt.s32.totalorder %s1141_s12, 1  ;;  %v210_v36 = vlaneseq  ;;  %vm583_vm2 = vcmask 523264   ;;  %s664_s16 = sld [smem:[#allocation2]] }
   0xe   : > { %s1985_s12 = smov (!%p135_p3, %s1141_s12), 1  ;;  %v211_v42 = vand.u32 127, %v210_v36 }
   0xf   : > { %s1204_s0 = sshll.u32 %s1985_s12, 9 }
  0x10   : > { %s1318_s15 = scalar_lea.vmem %s1919_s1, %s1204_s0  ;;  %v1437_v44 = vadd.s32 896, %v211_v42  ;;  %s1769_s19 = scalar_lea.vmem %s1920_s2, %s1204_s0 }
  0x11   : > { %v195_v0 = vld [vmem:[%s1318_s15 + $0x188] sm:$0xff]  ;;  %v197_v2 = vld [vmem:[%s1318_s15 + $0x198] sm:$0xff]  ;;  %v194_v5 = vld [vmem:[%s1318_s15 + $0x180] sm:$0xff] }
  0x12   : > { %v203_v1 = vld [vmem:[%s1318_s15 + $0x1c8] sm:$0xff]  ;;  %v205_v4 = vld [vmem:[%s1318_s15 + $0x1d8] sm:$0xff]  ;;  %v202_v6 = vld [vmem:[%s1318_s15 + $0x1c0] sm:$0xff]  ;;  %1945 = vst [vmem:[#allocation6_spill] sm:$0xff] %v1437_v44  ;;  %vm226_vm0 = vcmp.lt.s32.totalorder %v1437_v44, 960 }
  0x13   : > { %v1323_v3 = vpack.c.bf16 %v203_v1, %v195_v0  ;;  %v1328_v7 = vpack.c.bf16 %v205_v4, %v197_v2  ;;  %v1330_v8 = vpack.c.bf16 %v202_v6, %v194_v5  ;;  %v196_v9 = vld [vmem:[%s1318_s15 + $0x190] sm:$0xff]  ;;  %v179_v11 = vld [vmem:[%s1318_s15 + $0x108] sm:$0xff]  ;;  %v181_v14 = vld [vmem:[%s1318_s15 + $0x118] sm:$0xff] }
  0x14   : > { %v204_v10 = vld [vmem:[%s1318_s15 + $0x1d0] sm:$0xff]  ;;  %v187_v13 = vld [vmem:[%s1318_s15 + $0x148] sm:$0xff]  ;;  %v189_v15 = vld [vmem:[%s1318_s15 + $0x158] sm:$0xff] }
  0x15   : > { %331 = vmatprep.subr.bf16.mxu0 %v1323_v3  ;;  %v1336_v12 = vpack.c.bf16 %v204_v10, %v196_v9  ;;  %396 = vmatprep.subr.bf16.mxu1 %v1328_v7  ;;  %v1343_v16 = vpack.c.bf16 %v187_v13, %v179_v11  ;;  %v1345_v17 = vpack.c.bf16 %v189_v15, %v181_v14  ;;  %v1349_v18 = vld [vmem:[%s1318_s15 + $0x100] sm:$0xff]  ;;  %v1355_v20 = vld [vmem:[%s1318_s15 + $0x110] sm:$0xff]  ;;  %v1363_v22 = vld [vmem:[%s1318_s15 + $0x88] sm:$0xff] }
  0x16   : > { %332 = vmatpush1.bf16.xpose.msra.mxu0 %v1330_v8  ;;  %v1352_v19 = vld [vmem:[%s1318_s15 + $0x140] sm:$0xff]  ;;  %1943 = vst [vmem:[#allocation4_spill] sm:$0xff] %v1355_v20  ;;  %v1360_v21 = vld [vmem:[%s1318_s15 + $0x150] sm:$0xff]  ;;  %v1366_v23 = vld [vmem:[%s1318_s15 + $0xc8] sm:$0xff] }
  0x17   : > { %397 = vmatpush1.bf16.xpose.msra.mxu1 %v1336_v12  ;;  %1942 = vst [vmem:[#allocation3_spill] sm:$0xff] %v1352_v19  ;;  %333 = vmatprep.subr.bf16.mxu0 %v1343_v16  ;;  %1944 = vst [vmem:[#allocation5_spill] sm:$0xff] %v1360_v21  ;;  %v1369_v24 = vld [vmem:[%s1318_s15 + $0x98] sm:$0xff]  ;;  %v1376_v26 = vpack.c.bf16 %v1352_v19, %v1349_v18  ;;  %v1379_v27 = vld [vmem:[%s1318_s15 + $0x8] sm:$0xff]  ;;  %v1389_v30 = vpack.c.bf16 %v1360_v21, %v1355_v20 }
  0x18   : > { %398 = vmatprep.subr.bf16.mxu1 %v1345_v17  ;;  %v1372_v25 = vld [vmem:[%s1318_s15 + $0xd8] sm:$0xff]  ;;  %v1382_v28 = vld [vmem:[%s1318_s15 + $0x48] sm:$0xff]  ;;  %v1393_v31 = vpack.c.bf16 %v1366_v23, %v1363_v22  ;;  %v1416_v37 = vld [vmem:[%s1318_s15 + $0x80] sm:$0xff] }
  0x19   : > { %v1385_v29 = vld [vmem:[%s1318_s15 + $0x18] sm:$0xff]  ;;  %v1397_v32 = vpack.c.bf16 %v1382_v28, %v1379_v27  ;;  %v1404_v34 = vpack.c.bf16 %v1372_v25, %v1369_v24  ;;  %v1419_v38 = vld [vmem:[%s1318_s15 + $0xc0] sm:$0xff]  ;;  %v1423_v39 = vld [vmem:[%s1318_s15 + $0x90] sm:$0xff] }
  0x1a   : > { %v1400_v33 = vld [vmem:[%s1318_s15 + $0x58] sm:$0xff]  ;;  %v1426_v40 = vld [vmem:[%s1318_s15 + $0xd0] sm:$0xff]  ;;  %v1430_v41 = vpack.c.bf16 %v1419_v38, %v1416_v37  ;;  %v1442_v45 = vld [vmem:[%s1318_s15] sm:$0xff] }
  0x1b   : > { %v1408_v35 = vpack.c.bf16 %v1400_v33, %v1385_v29  ;;  %355 = vmatprep.mubr.bf16.mxu0 %v1397_v32  ;;  %v1434_v43 = vpack.c.bf16 %v1426_v40, %v1423_v39  ;;  %v1445_v46 = vld [vmem:[%s1318_s15 + $0x40] sm:$0xff]  ;;  %v1448_v47 = vld [vmem:[%s1318_s15 + $0x10] sm:$0xff]  ;;  %v199_v49 = vld [vmem:[%s1318_s15 + $0x1a8] sm:$0xff] }
  0x1c   : > { %v1452_v48 = vld [vmem:[%s1318_s15 + $0x50] sm:$0xff]  ;;  %v207_v50 = vld [vmem:[%s1318_s15 + $0x1e8] sm:$0xff]  ;;  %v201_v51 = vld [vmem:[%s1318_s15 + $0x1b8] sm:$0xff]  ;;  %v1460_v53 = vpack.c.bf16 %v1445_v46, %v1442_v45 }
  0x1d   : > { %420 = vmatprep.mubr.bf16.mxu1 %v1408_v35  ;;  %v209_v52 = vld [vmem:[%s1318_s15 + $0x1f8] sm:$0xff]  ;;  %v1465_v54 = vpack.c.bf16 %v1452_v48, %v1448_v47  ;;  %v1467_v55 = vpack.c.bf16 %v207_v50, %v199_v49  ;;  %vm1474_vm1 = vmpackc.low %vm226_vm0, %vm226_vm0  ;;  %v198_v58 = vld [vmem:[%s1318_s15 + $0x1a0] sm:$0xff] }
  0x1e   : > { %334 = vmatpush1.bf16.xpose.msra.mxu0 %v1376_v26  ;;  %v1469_v56 = vpack.c.bf16 %v209_v52, %v201_v51  ;;  %v206_v59 = vld [vmem:[%s1318_s15 + $0x1e0] sm:$0xff]  ;;  %v200_v60 = vld [vmem:[%s1318_s15 + $0x1b0] sm:$0xff]  ;;  %v183_v62 = vld [vmem:[%s1318_s15 + $0x128] sm:$0xff] }
  0x1f   : > { %399 = vmatpush1.bf16.xpose.msra.mxu1 %v1389_v30  ;;  %335 = vmatprep.subr.bf16.mxu0 %v1393_v31  ;;  %v208_v61 = vld [vmem:[%s1318_s15 + $0x1f0] sm:$0xff]  ;;  %v191_v63 = vld [vmem:[%s1318_s15 + $0x168] sm:$0xff]  ;;  %v1490_v0 = vpack.c.bf16 %v206_v59, %v198_v58  ;;  %v185_v1 = vld [vmem:[%s1318_s15 + $0x138] sm:$0xff] }
  0x20   : > { %400 = vmatprep.subr.bf16.mxu1 %v1404_v34  ;;  %v193_v2 = vld [vmem:[%s1318_s15 + $0x178] sm:$0xff]  ;;  %v1494_v4 = vpack.c.bf16 %v208_v61, %v200_v60  ;;  %v1496_v5 = vpack.c.bf16 %v191_v63, %v183_v62  ;;  %v182_v9 = vld [vmem:[%s1318_s15 + $0x120] sm:$0xff]  ;;  %v184_v11 = vld [vmem:[%s1318_s15 + $0x130] sm:$0xff] }
  0x21   : > { %v1499_v6 = vpack.c.bf16 %v193_v2, %v185_v1  ;;  %v190_v10 = vld [vmem:[%s1318_s15 + $0x160] sm:$0xff]  ;;  %v192_v13 = vld [vmem:[%s1318_s15 + $0x170] sm:$0xff]  ;;  %v1515_v14 = vld [vmem:[%s1318_s15 + $0xa8] sm:$0xff] }
  0x22   : > { %1948 = vst [vmem:[#allocation7_spill] sm:$0xff] %v1515_v14  ;;  %v1518_v15 = vld [vmem:[%s1318_s15 + $0xe8] sm:$0xff]  ;;  %v1520_v36 = vpack.c.bf16 %v190_v10, %v182_v9  ;;  %v1523_v42 = vld [vmem:[%s1318_s15 + $0xb8] sm:$0xff]  ;;  %v1528_v50 = vpack.c.bf16 %v192_v13, %v184_v11  ;;  %v1544_v58 = vld [vmem:[%s1318_s15 + $0xa0] sm:$0xff] }
  0x23   : > { %1949 = vst [vmem:[#allocation8_spill] sm:$0xff] %v1518_v15  ;;  %1950 = vst [vmem:[#allocation9_spill] sm:$0xff] %v1523_v42  ;;  %v1526_v49 = vld [vmem:[%s1318_s15 + $0xf8] sm:$0xff]  ;;  %v1532_v51 = vpack.c.bf16 %v1518_v15, %v1515_v14  ;;  %v1547_v59 = vld [vmem:[%s1318_s15 + $0xe0] sm:$0xff] }
  0x24   : > { %1951 = vst [vmem:[#allocation10_spill] sm:$0xff] %v1526_v49  ;;  %v1537_v52 = vpack.c.bf16 %v1526_v49, %v1523_v42  ;;  %1952 = vst [vmem:[#allocation11_spill] sm:$0xff] %v1544_v58  ;;  %v1552_v60 = vld [vmem:[%s1318_s15 + $0xb0] sm:$0xff]  ;;  %v1561_v62 = vld [vmem:[%s1318_s15 + $0x28] sm:$0xff]  ;;  %v1568_v1 = vpack.c.bf16 %v1547_v59, %v1544_v58 }
  0x25   : > { %1953 = vst [vmem:[#allocation12_spill] sm:$0xff] %v1547_v59  ;;  %1954 = vst [vmem:[#allocation13_spill] sm:$0xff] %v1552_v60  ;;  %v1555_v61 = vld [vmem:[%s1318_s15 + $0xf0] sm:$0xff]  ;;  %v1564_v63 = vld [vmem:[%s1318_s15 + $0x68] sm:$0xff] }
  0x26   : > { %336 = vmatpush1.bf16.xpose.msra.mxu0 %v1430_v41  ;;  %1955 = vst [vmem:[#allocation14_spill] sm:$0xff] %v1555_v61  ;;  %1956 = vst [vmem:[#allocation15_spill] sm:$0xff] %v1561_v62  ;;  %v1571_v2 = vld [vmem:[%s1318_s15 + $0x38] sm:$0xff]  ;;  %v1578_v10 = vpack.c.bf16 %v1555_v61, %v1552_v60  ;;  %v1582_v11 = vpack.c.bf16 %v1564_v63, %v1561_v62  ;;  %v1594_v15 = vld [vmem:[%s1318_s15 + $0x20] sm:$0xff] }
  0x27   : > { %401 = vmatpush1.bf16.xpose.msra.mxu1 %v1434_v43  ;;  %337 = vmatprep.subr.bf16.mxu0 %v1397_v32  ;;  %1957 = vst [vmem:[#allocation16_spill] sm:$0xff] %v1564_v63  ;;  %1958 = vst [vmem:[#allocation17_spill] sm:$0xff] %v1571_v2  ;;  %v1574_v9 = vld [vmem:[%s1318_s15 + $0x78] sm:$0xff]  ;;  %v1597_v61 = vld [vmem:[%s1318_s15 + $0x60] sm:$0xff] }
  0x28   : > { %402 = vmatprep.subr.bf16.mxu1 %v1408_v35  ;;  %1959 = vst [vmem:[#allocation18_spill] sm:$0xff] %v1574_v9  ;;  %v1587_v13 = vpack.c.bf16 %v1574_v9, %v1571_v2  ;;  %1960 = vst [vmem:[#allocation19_spill] sm:$0xff] %v1594_v15  ;;  %v1602_v59 = vld [vmem:[%s1318_s15 + $0x30] sm:$0xff]  ;;  %v1612_v14 = vpack.c.bf16 %v1597_v61, %v1594_v15 }
  0x29   : > { %1961 = vst [vmem:[#allocation20_spill] sm:$0xff] %v1597_v61  ;;  %1962 = vst [vmem:[#allocation21_spill] sm:$0xff] %v1602_v59  ;;  %v1605_v49 = vld [vmem:[%s1318_s15 + $0x70] sm:$0xff] }
  0x2a   : > { %1963 = vst [vmem:[#allocation22_spill] sm:$0xff] %v1605_v49  ;;  %v1616_v60 = vpack.c.bf16 %v1605_v49, %v1602_v59 }
  0x2e   : > { %338 = vmatpush1.bf16.xpose.msra.mxu0 %v1460_v53 }
  0x2f   : > { %403 = vmatpush1.bf16.xpose.msra.mxu1 %v1465_v54  ;;  %461 = vmatprep.subr.bf16.mxu0 %v1467_v55 }
  0x30   : > { %1152 = vmatprep.subr.msk.bf16.mxu1 %vm1474_vm1, %v1469_v56 }
  0x35   : > { %356 = vmatmul.mubr.bf16.vlgmr.msra.gmra.mxu0 %v1460_v53 }
  0x36   : > { %421 = vmatmul.mubr.bf16.vlgmr.msra.gmra.mxu1 %v1465_v54  ;;  %462 = vmatpush1.bf16.xpose.msra.mxu0 %v1490_v0 }
  0x37   : > { %527 = vmatpush1.bf16.xpose.msra.mxu1 %v1494_v4  ;;  %363 = vmatprep.mubr.bf16.mxu0 %v1393_v31 }
  0x38   : > { %428 = vmatprep.mubr.bf16.mxu1 %v1404_v34  ;;  %463 = vmatprep.subr.bf16.mxu0 %v1496_v5 }
  0x39   : > { %1155 = vmatprep.subr.msk.bf16.mxu1 %vm1474_vm1, %v1499_v6 }
  0x3d   : > { %364 = vmatmul.mubr.bf16.gmra.mxu0 %v1430_v41 }
  0x3e   : > { %429 = vmatmul.mubr.bf16.gmra.mxu1 %v1434_v43  ;;  %464 = vmatpush1.bf16.xpose.msra.mxu0 %v1520_v36 }
  0x3f   : > { %529 = vmatpush1.bf16.xpose.msra.mxu1 %v1528_v50  ;;  %371 = vmatprep.mubr.bf16.mxu0 %v1343_v16 }
  0x40   : > { %436 = vmatprep.mubr.bf16.mxu1 %v1345_v17  ;;  %465 = vmatprep.subr.bf16.mxu0 %v1532_v51 }
  0x41   : > { %1158 = vmatprep.subr.msk.bf16.mxu1 %vm1474_vm1, %v1537_v52 }
  0x45   : > { %372 = vmatmul.mubr.bf16.gmra.mxu0 %v1376_v26 }
  0x46   : > { %437 = vmatmul.mubr.bf16.gmra.mxu1 %v1389_v30  ;;  %466 = vmatpush1.bf16.xpose.msra.mxu0 %v1568_v1 }
  0x47   : > { %531 = vmatpush1.bf16.xpose.msra.mxu1 %v1578_v10  ;;  %379 = vmatprep.mubr.bf16.mxu0 %v1323_v3 }
  0x48   : > { %444 = vmatprep.mubr.bf16.mxu1 %v1328_v7  ;;  %467 = vmatprep.subr.bf16.mxu0 %v1582_v11 }
  0x49   : > { %1161 = vmatprep.subr.msk.bf16.mxu1 %vm1474_vm1, %v1587_v13 }
  0x4d   : > { %380 = vmatmul.mubr.bf16.gmra.mxu0 %v1330_v8 }
  0x4e   : > { %445 = vmatmul.mubr.bf16.gmra.mxu1 %v1336_v12  ;;  %468 = vmatpush1.bf16.xpose.msra.mxu0 %v1612_v14 }
  0x4f   : > { %533 = vmatpush1.bf16.xpose.msra.mxu1 %v1616_v60  ;;  %485 = vmatprep.mubr.bf16.mxu0 %v1582_v11 }
  0x50   : > { %1164 = vmatprep.mubr.msk.bf16.mxu1 %vm1474_vm1, %v1587_v13  ;;  %738 = vmatprep.subr.bf16.mxu0 %v1323_v3 }
  0x51   : > { %811 = vmatprep.subr.bf16.mxu1 %v1328_v7 }
  0x55   : > { %486 = vmatmul.mubr.bf16.vlgmr.msra.gmra.mxu0 %v1612_v14 }
  0x56   : > { %551 = vmatmul.mubr.bf16.vlgmr.msra.gmra.mxu1 %v1616_v60  ;;  %493 = vmatprep.mubr.bf16.mxu0 %v1532_v51 }
  0x57   : > { %1167 = vmatprep.mubr.msk.bf16.mxu1 %vm1474_vm1, %v1537_v52  ;;  %739 = vmatpush1.bf16.msra.mxu0 %v1330_v8 }
  0x58   : > { %812 = vmatpush1.bf16.msra.mxu1 %v1336_v12  ;;  %740 = vmatprep.subr.bf16.mxu0 %v1343_v16 }
  0x59   : > { %813 = vmatprep.subr.bf16.mxu1 %v1345_v17 }
  0x5b   : > { %741 = vmatpush1.bf16.msra.mxu0 %v1376_v26 }
  0x5c   : > { %814 = vmatpush1.bf16.msra.mxu1 %v1389_v30  ;;  %742 = vmatprep.subr.bf16.mxu0 %v1393_v31 }
  0x5d   : > { %494 = vmatmul.mubr.bf16.gmra.mxu0 %v1568_v1  ;;  %815 = vmatprep.subr.bf16.mxu1 %v1404_v34 }
  0x5e   : > { %559 = vmatmul.mubr.bf16.gmra.mxu1 %v1578_v10  ;;  %501 = vmatprep.mubr.bf16.mxu0 %v1496_v5 }
  0x5f   : > { %1170 = vmatprep.mubr.msk.bf16.mxu1 %vm1474_vm1, %v1499_v6  ;;  %743 = vmatpush1.bf16.msra.mxu0 %v1430_v41 }
  0x60   : > { %816 = vmatpush1.bf16.msra.mxu1 %v1434_v43  ;;  %744 = vmatprep.subr.bf16.mxu0 %v1397_v32 }
  0x61   : > { %817 = vmatprep.subr.bf16.mxu1 %v1408_v35 }
  0x63   : > { %745 = vmatpush1.bf16.msra.mxu0 %v1460_v53 }
  0x64   : > { %818 = vmatpush1.bf16.msra.mxu1 %v1465_v54  ;;  %884 = vmatprep.subr.bf16.mxu0 %v1467_v55 }
  0x65   : > { %502 = vmatmul.mubr.bf16.gmra.mxu0 %v1520_v36  ;;  %1188 = vmatprep.subr.msk.bf16.mxu1 %vm1474_vm1, %v1469_v56 }
  0x66   : > { %567 = vmatmul.mubr.bf16.gmra.mxu1 %v1528_v50  ;;  %509 = vmatprep.mubr.bf16.mxu0 %v1467_v55 }
  0x67   : > { %1173 = vmatprep.mubr.msk.bf16.mxu1 %vm1474_vm1, %v1469_v56 }
  0x6d   : > { %510 = vmatmul.mubr.bf16.gmra.mxu0 %v1490_v0 }
  0x6e   : > { %575 = vmatmul.mubr.bf16.gmra.mxu1 %v1494_v4 }
  0xf5   : > { %v357_v3 = vpop.f32.mrf.mxu0 }
  0xf6   : > { %v422_v7 = vpop.f32.mrf.mxu1 }
  0xf7   : > { %v359_v8 = vpop.f32.mrf.mxu0  ;;  %v423_v59 = vadd.f32 %v422_v7, %v357_v3 }
  0xf8   : > { %v424_v12 = vpop.f32.mrf.mxu1 }
  0xf9   : > { %v360_v16 = vpop.f32.mrf.mxu0 }
  0xfa   : > { %v425_v17 = vpop.f32.mrf.mxu1 }
  0xfb   : > { %v362_v26 = vpop.f32.mrf.mxu0 }
  0xfc   : > { %v427_v30 = vpop.f32.mrf.mxu1 }
  0xfd   : > { %v365_v31 = vpop.f32.mrf.mxu0 }
  0xfe   : > { %v430_v32 = vpop.f32.mrf.mxu1 }
  0xff   : > { %v367_v34 = vpop.f32.mrf.mxu0 }
 0x100   : > { %v432_v35 = vpop.f32.mrf.mxu1 }
 0x101   : > { %v368_v41 = vpop.f32.mrf.mxu0 }
 0x102   : > { %v433_v43 = vpop.f32.mrf.mxu1 }
 0x103   : > { %v370_v53 = vpop.f32.mrf.mxu0 }
 0x104   : > { %v435_v54 = vpop.f32.mrf.mxu1 }
 0x105   : > { %v373_v55 = vpop.f32.mrf.mxu0 }
 0x106   : > { %v438_v56 = vpop.f32.mrf.mxu1 }
 0x107   : > { %v375_v58 = vpop.f32.mrf.mxu0 }
 0x108   : > { %v440_v42 = vpop.f32.mrf.mxu1 }
 0x109   : > { %v376_v63 = vpop.f32.mrf.mxu0  ;;  %v426_v42 = vadd.f32 %v425_v17, %v360_v16 }
 0x10a   : > { %v441_v49 = vpop.f32.mrf.mxu1 }
 0x10b   : > { %v378_v8 = vpop.f32.mrf.mxu0 }
 0x10c   : > { %v443_v12 = vpop.f32.mrf.mxu1 }
 0x10d   : > { %v381_v61 = vpop.f32.mrf.mxu0 }
 0x10e   : > { %v446_v9 = vpop.f32.mrf.mxu1 }
 0x10f   : > { %v383_v26 = vpop.f32.mrf.mxu0 }
 0x110   : > { %v448_v30 = vpop.f32.mrf.mxu1 }
 0x111   : > { %v1666_v62 = vpop.f32.mrf.mxu0 }
 0x112   : > { %v1668_v34 = vpop.f32.mrf.mxu1 }
 0x113   : > { %v386_v35 = vpop.f32.mrf.mxu0 }
 0x114   : > { %v451_v53 = vpop.f32.mrf.mxu1  ;;  %v431_v35 = vadd.f32 %v430_v32, %v365_v31  ;;  %v439_v31 = vadd.f32 %v438_v56, %v373_v55 }
 0x115   : > { %v487_v54 = vpop.f32.mrf.mxu0 }
 0x116   : > { %v488_v15 = vadd.f32 %v487_v54, %v423_v59  ;;  %v552_v44 = vpop.f32.mrf.mxu1 }
 0x117   : > { %v489_v58 = vpop.f32.mrf.mxu0 }
 0x118   : > { %v1670_v2 = vadd.f32 %v552_v44, %v488_v15  ;;  %v554_v8 = vpop.f32.mrf.mxu1  ;;  %v434_v44 = vadd.f32 %v433_v43, %v368_v41  ;;  %v442_v41 = vadd.f32 %v441_v49, %v376_v63  ;;  %v450_v49 = vadd.f32 %v1668_v34, %v1666_v62 }
 0x119   : > { %v490_v12 = vpop.f32.mrf.mxu0 }
 0x11a   : > { %v491_v21 = vadd.f32 %v490_v12, %v426_v42  ;;  %v555_v26 = vpop.f32.mrf.mxu1  ;;  %v584_v30 = vsel %vm583_vm2, %v1670_v2, -inf }
 0x11b   : > { %v492_v19 = vpop.f32.mrf.mxu0  ;;  %585 = vmax.xlane.f32.xlu0 %v584_v30 }
 0x11c   : > { %v556_v3 = vadd.f32 %v555_v26, %v491_v21  ;;  %v557_v7 = vpop.f32.mrf.mxu1 }
 0x11d   : > { %v495_v53 = vpop.f32.mrf.mxu0 }
 0x11e   : > { %v496_v59 = vadd.f32 %v495_v53, %v431_v35  ;;  %v560_v54 = vpop.f32.mrf.mxu1  ;;  %v587_v58 = vsel %vm583_vm2, %v556_v3, -inf }
 0x11f   : > { %v497_v16 = vpop.f32.mrf.mxu0  ;;  %588 = vmax.xlane.f32.xlu0 %v587_v58 }
 0x120   : > { %v561_v15 = vadd.f32 %v560_v54, %v496_v59  ;;  %v562_v17 = vpop.f32.mrf.mxu1 }
 0x121   : > { %v498_v42 = vpop.f32.mrf.mxu0 }
 0x122   : > { %v499_v8 = vadd.f32 %v498_v42, %v434_v44  ;;  %v563_v12 = vpop.f32.mrf.mxu1  ;;  %v590_v20 = vsel %vm583_vm2, %v561_v15, -inf }
 0x123   : > { %v500_v19 = vpop.f32.mrf.mxu0  ;;  %591 = vmax.xlane.f32.xlu1 %v590_v20  ;;  %v447_v20 = vadd.f32 %v446_v9, %v381_v61 }
 0x124   : > { %v564_v21 = vadd.f32 %v563_v12, %v499_v8  ;;  %v565_v32 = vpop.f32.mrf.mxu1 }
 0x125   : > { %v503_v26 = vpop.f32.mrf.mxu0 }
 0x126   : > { %v504_v30 = vadd.f32 %v503_v26, %v439_v31  ;;  %v568_v35 = vpop.f32.mrf.mxu1  ;;  %v593_v7 = vsel %vm583_vm2, %v564_v21, -inf }
 0x127   : > { %v505_v53 = vpop.f32.mrf.mxu0  ;;  %594 = vmax.xlane.f32.xlu1 %v593_v7 }
 0x128   : > { %v569_v43 = vadd.f32 %v568_v35, %v504_v30  ;;  %v570_v59 = vpop.f32.mrf.mxu1 }
 0x129   : > { %v506_v54 = vpop.f32.mrf.mxu0 }
 0x12a   : > { %v507_v58 = vadd.f32 %v506_v54, %v442_v41  ;;  %v571_v16 = vpop.f32.mrf.mxu1  ;;  %v596_v44 = vsel %vm583_vm2, %v569_v43, -inf }
 0x12b   : > { %v508_v17 = vpop.f32.mrf.mxu0  ;;  %597 = vmax.xlane.f32.xlu0 %v596_v44 }
 0x12c   : > { %v572_v55 = vadd.f32 %v571_v16, %v507_v58  ;;  %v573_v56 = vpop.f32.mrf.mxu1 }
 0x12d   : > { %v511_v42 = vpop.f32.mrf.mxu0 }
 0x12e   : > { %v512_v8 = vadd.f32 %v511_v42, %v447_v20  ;;  %v576_v12 = vpop.f32.mrf.mxu1  ;;  %v599_v19 = vsel %vm583_vm2, %v572_v55, -inf }
 0x12f   : > { %v513_v31 = vpop.f32.mrf.mxu0  ;;  %600 = vmax.xlane.f32.xlu1 %v599_v19 }
 0x130   : > { %v577_v63 = vadd.f32 %v576_v12, %v512_v8  ;;  %v578_v32 = vpop.f32.mrf.mxu1 }
 0x131   : > { %v514_v26 = vpop.f32.mrf.mxu0 }
 0x132   : > { %v515_v30 = vadd.f32 %v514_v26, %v450_v49  ;;  %v579_v35 = vpop.f32.mrf.mxu1  ;;  %v602_v7 = vsel %vm583_vm2, %v577_v63, -inf }
 0x133   : > { %v516_v61 = vpop.f32.mrf.mxu0  ;;  %603 = vmax.xlane.f32.xlu0 %v602_v7 }
 0x134   : > { %v580_v9 = vadd.f32 %v579_v35, %v515_v30  ;;  %v581_v53 = vpop.f32.mrf.mxu1 }
 0x136   : > { %v605_v41 = vsel %vm583_vm2, %v580_v9, -inf }
 0x137   : > { %606 = vmax.xlane.f32.xlu1 %v605_v41 }
 0x1a4   : > { %v586_v59 = vpop.xlane.xlu0 %585 }
 0x1a5   : > { %v608_v54 = vsub.f32 %v586_v59, %v1670_v2 }
 0x1a7   : > { %v616_v58 = vsel %vm583_vm2, %v608_v54, -inf }
 0x1a8   : > { %617 = vmax.xlane.f32.xlu0 %v616_v58  ;;  %v589_v62 = vpop.xlane.xlu0 %588 }
 0x1a9   : > { %v609_v34 = vsub.f32 %v589_v62, %v556_v3 }
 0x1ab   : > { %v619_v16 = vsel %vm583_vm2, %v609_v34, -inf }
 0x1ac   : > { %v592_v44 = vpop.xlane.xlu1 %591  ;;  %620 = vmax.xlane.f32.xlu1 %v619_v16 }
 0x1ad   : > { %v610_v17 = vsub.f32 %v592_v44, %v561_v15 }
 0x1af   : > { %v622_v20 = vsel %vm583_vm2, %v610_v17, -inf }
 0x1b0   : > { %v595_v56 = vpop.xlane.xlu1 %594  ;;  %623 = vmax.xlane.f32.xlu0 %v622_v20 }
 0x1b1   : > { %v611_v42 = vsub.f32 %v595_v56, %v564_v21 }
 0x1b3   : > { %v625_v8 = vsel %vm583_vm2, %v611_v42, -inf }
 0x1b4   : > { %626 = vmax.xlane.f32.xlu1 %v625_v8  ;;  %v598_v12 = vpop.xlane.xlu0 %597 }
 0x1b5   : > { %v612_v2 = vsub.f32 %v598_v12, %v569_v43 }
 0x1b7   : > { %v628_v19 = vsel %vm583_vm2, %v612_v2, -inf }
 0x1b8   : > { %v601_v31 = vpop.xlane.xlu1 %600  ;;  %629 = vmax.xlane.f32.xlu0 %v628_v19 }
 0x1b9   : > { %v613_v3 = vsub.f32 %v601_v31, %v572_v55 }
 0x1bb   : > { %v631_v49 = vsel %vm583_vm2, %v613_v3, -inf }
 0x1bc   : > { %632 = vmax.xlane.f32.xlu1 %v631_v49  ;;  %v604_v32 = vpop.xlane.xlu0 %603 }
 0x1bd   : > { %v614_v15 = vsub.f32 %v604_v32, %v577_v63 }
 0x1bf   : > { %v634_v26 = vsel %vm583_vm2, %v614_v15, -inf }
 0x1c0   : > { %v607_v30 = vpop.xlane.xlu1 %606  ;;  %635 = vmax.xlane.f32.xlu0 %v634_v26 }
 0x1c1   : > { %v615_v21 = vsub.f32 %v607_v30, %v580_v9 }
 0x1c3   : > { %v637_v35 = vsel %vm583_vm2, %v615_v21, -inf }
 0x1c4   : > { %638 = vmax.xlane.f32.xlu1 %v637_v35 }
 0x231   : > { %v618_v7 = vpop.xlane.xlu0 %617 }
 0x232   : > { %v640_v43 = vsub.f32 %v608_v54, %v618_v7 }
 0x234   : > { %v648_v61 = vmul.f32 1.442695, %v640_v43 }
 0x235   : > { %v621_v53 = vpop.xlane.xlu1 %620 }
 0x236   : > { %1215 = vpow2.f32 %v648_v61  ;;  %v641_v41 = vsub.f32 %v609_v34, %v621_v53 }
 0x238   : > { %v650_v55 = vmul.f32 1.442695, %v641_v41 }
 0x239   : > { %v624_v59 = vpop.xlane.xlu0 %623 }
 0x23a   : > { %1217 = vpow2.f32 %v650_v55  ;;  %v642_v58 = vsub.f32 %v610_v17, %v624_v59 }
 0x23c   : > { %v652_v62 = vmul.f32 1.442695, %v642_v58 }
 0x23d   : > { %v627_v63 = vpop.xlane.xlu1 %626 }
 0x23e   : > { %1219 = vpow2.f32 %v652_v62  ;;  %v643_v16 = vsub.f32 %v611_v42, %v627_v63  ;;  %v1283_v62 = vmov 0  }
 0x23f   : > { %762 = vmatprep.mubr.bf16.mxu0 %v1283_v62  ;;  %835 = vmatprep.mubr.bf16.mxu1 %v1283_v62 }
 0x240   : > { %v654_v44 = vmul.f32 1.442695, %v643_v16 }
 0x241   : > { %v630_v20 = vpop.xlane.xlu0 %629 }
 0x242   : > { %1221 = vpow2.f32 %v654_v44  ;;  %v644_v9 = vsub.f32 %v612_v2, %v630_v20 }
 0x243   : > { %v1216_v56 = vpop.eup %1215 }
 0x244   : > { %v656_v8 = vmul.f32 1.442695, %v644_v9  ;;  %v665_v54 = vsel %vm583_vm2, %v1216_v56, 0.0 }
 0x245   : > { %v633_v12 = vpop.xlane.xlu1 %632  ;;  %666 = vadd.xlane.f32.xlu0 %v665_v54 }
 0x246   : > { %1223 = vpow2.f32 %v656_v8  ;;  %v645_v34 = vsub.f32 %v613_v3, %v633_v12 }
 0x247   : > { %v1218_v19 = vpop.eup %1217 }
 0x248   : > { %v658_v31 = vmul.f32 1.442695, %v645_v34  ;;  %v668_v17 = vsel %vm583_vm2, %v1218_v19, 0.0  ;;  %v705_v34 = vstv %s664_s16 }
 0x249   : > { %669 = vadd.xlane.f32.xlu1 %v668_v17  ;;  %v636_v49 = vpop.xlane.xlu0 %635 }
 0x24a   : > { %1225 = vpow2.f32 %v658_v31  ;;  %v646_v42 = vsub.f32 %v614_v15, %v636_v49 }
 0x24b   : > { %v1220_v32 = vpop.eup %1219 }
 0x24c   : > { %v660_v26 = vmul.f32 1.442695, %v646_v42  ;;  %v671_v2 = vsel %vm583_vm2, %v1220_v32, 0.0 }
 0x24d   : > { %v639_v30 = vpop.xlane.xlu1 %638  ;;  %672 = vadd.xlane.f32.xlu0 %v671_v2 }
 0x24e   : > { %1227 = vpow2.f32 %v660_v26  ;;  %v647_v35 = vsub.f32 %v615_v21, %v639_v30 }
 0x24f   : > { %v1222_v7 = vpop.eup %1221 }
 0x250   : > { %v662_v43 = vmul.f32 1.442695, %v647_v35  ;;  %v674_v3 = vsel %vm583_vm2, %v1222_v7, 0.0 }
 0x251   : > { %675 = vadd.xlane.f32.xlu1 %v674_v3 }
 0x252   : > { %1229 = vpow2.f32 %v662_v43 }
 0x253   : > { %v1224_v61 = vpop.eup %1223 }
 0x254   : > { %v677_v53 = vsel %vm583_vm2, %v1224_v61, 0.0 }
 0x255   : > { %678 = vadd.xlane.f32.xlu0 %v677_v53 }
 0x257   : > { %v1697_v41 = vpop.eup %1225 }
 0x258   : > { %v680_v15 = vsel %vm583_vm2, %v1697_v41, 0.0 }
 0x259   : > { %681 = vadd.xlane.f32.xlu1 %v680_v15 }
 0x25b   : > { %v1701_v55 = vpop.eup %1227 }
 0x25c   : > { %v683_v21 = vsel %vm583_vm2, %v1701_v55, 0.0 }
 0x25d   : > { %684 = vadd.xlane.f32.xlu0 %v683_v21 }
 0x25f   : > { %v1705_v59 = vpop.eup %1229 }
 0x260   : > { %v686_v58 = vsel %vm583_vm2, %v1705_v59, 0.0 }
 0x261   : > { %687 = vadd.xlane.f32.xlu1 %v686_v58 }
 0x2ce   : > { %v667_v63 = vpop.xlane.xlu0 %666 }
 0x2cf   : > { %1231 = vrcp.f32 %v667_v63 }
 0x2d2   : > { %v670_v16 = vpop.xlane.xlu1 %669 }
 0x2d3   : > { %1233 = vrcp.f32 %v670_v16 }
 0x2d6   : > { %v673_v44 = vpop.xlane.xlu0 %672 }
 0x2d7   : > { %1235 = vrcp.f32 %v673_v44 }
 0x2da   : > { %v676_v20 = vpop.xlane.xlu1 %675 }
 0x2db   : > { %1237 = vrcp.f32 %v676_v20 }
 0x2dc   : > { %v1232_v9 = vpop.eup %1231 }
 0x2dd   : > { %v690_v54 = vmul.f32 %v1232_v9, %v1216_v56 }
 0x2de   : > { %v679_v8 = vpop.xlane.xlu0 %678 }
 0x2df   : > { %1239 = vrcp.f32 %v679_v8  ;;  %v706_v49 = vmul.f32 %v705_v34, %v690_v54 }
 0x2e0   : > { %v1234_v12 = vpop.eup %1233 }
 0x2e1   : > { %v692_v31 = vmul.f32 %v1234_v12, %v1218_v19 }
 0x2e2   : > { %v682_v17 = vpop.xlane.xlu1 %681 }
 0x2e3   : > { %v707_v42 = vmul.f32 %v705_v34, %v692_v31  ;;  %1241 = vrcp.f32 %v682_v17 }
 0x2e4   : > { %v1236_v26 = vpop.eup %1235 }
 0x2e5   : > { %v714_v2 = vpack.c.bf16 %v707_v42, %v706_v49  ;;  %v694_v35 = vmul.f32 %v1236_v26, %v1220_v32 }
 0x2e6   : > { %v685_v30 = vpop.xlane.xlu0 %684 }
 0x2e7   : > { %1243 = vrcp.f32 %v685_v30  ;;  %1174 = vmatmul.mubr.msk.bf16.vlgmr.msra.gmra.mxu0 %vm583_vm2, %v714_v2  ;;  %1178 = vmatmul.mubr.msk.bf16.vlgmr.msra.gmra.mxu1 %vm583_vm2, %v714_v2  ;;  %v708_v3 = vmul.f32 %v705_v34, %v694_v35  ;;  %v1248_v30 = vld [vmem:[%s1318_s15 + $0x118] sm:$0xff] }
 0x2e8   : > { %v1238_v43 = vpop.eup %1237  ;;  %885 = vmatpush1.bf16.msra.mxu0 %v1490_v0  ;;  %958 = vmatpush1.bf16.msra.mxu1 %v1494_v4 }
 0x2e9   : > { %772 = vmatprep.mubr.bf16.mxu0 %v1283_v62  ;;  %845 = vmatprep.mubr.bf16.mxu1 %v1283_v62  ;;  %v696_v56 = vmul.f32 %v1238_v43, %v1222_v7 }
 0x2ea   : > { %v688_v19 = vpop.xlane.xlu1 %687  ;;  %886 = vmatprep.subr.bf16.mxu0 %v1496_v5  ;;  %1191 = vmatprep.subr.msk.bf16.mxu1 %vm1474_vm1, %v1499_v6 }
 0x2eb   : > { %1245 = vrcp.f32 %v688_v19  ;;  %v709_v32 = vmul.f32 %v705_v34, %v696_v56 }
 0x2ec   : > { %v1240_v53 = vpop.eup %1239  ;;  %887 = vmatpush1.bf16.msra.mxu0 %v1520_v36  ;;  %960 = vmatpush1.bf16.msra.mxu1 %v1528_v50 }
 0x2ed   : > { %v715_v0 = vpack.c.bf16 %v709_v32, %v708_v3  ;;  %888 = vmatprep.subr.bf16.mxu0 %v1532_v51  ;;  %1194 = vmatprep.subr.msk.bf16.mxu1 %vm1474_vm1, %v1537_v52  ;;  %v698_v4 = vmul.f32 %v1240_v53, %v1224_v61  ;;  %v1966_v3 = vld [vmem:[#allocation5_spill] sm:$0xff] }
 0x2ef   : > { %1175 = vmatmul.mubr.msk.bf16.gmra.mxu0 %vm583_vm2, %v715_v0  ;;  %1179 = vmatmul.mubr.msk.bf16.gmra.mxu1 %vm583_vm2, %v715_v0  ;;  %v710_v36 = vmul.f32 %v705_v34, %v698_v4  ;;  %v1249_v4 = vld [vmem:[%s1318_s15 + $0x148] sm:$0xff] }
 0x2f0   : > { %v1242_v5 = vpop.eup %1241  ;;  %782 = vmatprep.mubr.bf16.mxu0 %v1283_v62  ;;  %855 = vmatprep.mubr.bf16.mxu1 %v1283_v62 }
 0x2f1   : > { %v700_v6 = vmul.f32 %v1242_v5, %v1697_v41  ;;  %889 = vmatpush1.bf16.msra.mxu0 %v1568_v1  ;;  %962 = vmatpush1.bf16.msra.mxu1 %v1578_v10 }
 0x2f2   : > { %890 = vmatprep.subr.bf16.mxu0 %v1582_v11  ;;  %1197 = vmatprep.subr.msk.bf16.mxu1 %vm1474_vm1, %v1587_v13 }
 0x2f3   : > { %v711_v50 = vmul.f32 %v705_v34, %v700_v6  ;;  %v1250_v6 = vld [vmem:[%s1318_s15 + $0x158] sm:$0xff] }
 0x2f4   : > { %v1244_v51 = vpop.eup %1243 }
 0x2f5   : > { %v716_v52 = vpack.c.bf16 %v711_v50, %v710_v36  ;;  %891 = vmatpush1.bf16.msra.mxu0 %v1612_v14  ;;  %964 = vmatpush1.bf16.msra.mxu1 %v1616_v60  ;;  %v702_v1 = vmul.f32 %v1244_v51, %v1701_v55 }
 0x2f7   : > { %1176 = vmatmul.mubr.msk.bf16.gmra.mxu0 %vm583_vm2, %v716_v52  ;;  %1180 = vmatmul.mubr.msk.bf16.gmra.mxu1 %vm583_vm2, %v716_v52  ;;  %v712_v11 = vmul.f32 %v705_v34, %v702_v1 }
 0x2f8   : > { %v1246_v10 = vpop.eup %1245  ;;  %792 = vmatprep.mubr.bf16.mxu0 %v1283_v62  ;;  %865 = vmatprep.mubr.bf16.mxu1 %v1283_v62 }
 0x2f9   : > { %v704_v57 = vmul.f32 %v1246_v10, %v1705_v59  ;;  %v1252_v10 = vld [vmem:[%s1318_s15 + $0x190] sm:$0xff] }
 0x2fb   : > { %v713_v13 = vmul.f32 %v705_v34, %v704_v57 }
 0x2fd   : > { %v717_v7 = vpack.c.bf16 %v713_v13, %v712_v11 }
 0x2ff   : > { %1177 = vmatmul.mubr.msk.bf16.gmra.mxu0 %vm583_vm2, %v717_v7  ;;  %1181 = vmatmul.mubr.msk.bf16.gmra.mxu1 %vm583_vm2, %v717_v7 }
 0x300   : > { %908 = vmatprep.mubr.bf16.mxu0 %v1283_v62  ;;  %981 = vmatprep.mubr.bf16.mxu1 %v1283_v62 }
 0x307   : > { %1182 = vmatmul.mubr.msk.bf16.vlgmr.msra.gmra.mxu0 %vm583_vm2, %v714_v2  ;;  %1198 = vmatmul.mubr.msk.bf16.vlgmr.msra.gmra.mxu1 %vm583_vm2, %v714_v2 }
 0x308   : > { %918 = vmatprep.mubr.bf16.mxu0 %v1283_v62  ;;  %991 = vmatprep.mubr.bf16.mxu1 %v1283_v62 }
 0x30f   : > { %1183 = vmatmul.mubr.msk.bf16.gmra.mxu0 %vm583_vm2, %v715_v0  ;;  %1199 = vmatmul.mubr.msk.bf16.gmra.mxu1 %vm583_vm2, %v715_v0 }
 0x310   : > { %928 = vmatprep.mubr.bf16.mxu0 %v1283_v62  ;;  %1001 = vmatprep.mubr.bf16.mxu1 %v1283_v62 }
 0x317   : > { %1184 = vmatmul.mubr.msk.bf16.gmra.mxu0 %vm583_vm2, %v716_v52  ;;  %1200 = vmatmul.mubr.msk.bf16.gmra.mxu1 %vm583_vm2, %v716_v52  ;;  %v1251_v52 = vld [vmem:[%s1318_s15 + $0x180] sm:$0xff] }
 0x318   : > { %938 = vmatprep.mubr.bf16.mxu0 %v1283_v62  ;;  %1011 = vmatprep.mubr.bf16.mxu1 %v1283_v62 }
 0x31f   : > { %1185 = vmatmul.mubr.msk.bf16.gmra.mxu0 %vm583_vm2, %v717_v7  ;;  %1201 = vmatmul.mubr.msk.bf16.gmra.mxu1 %vm583_vm2, %v717_v7  ;;  %v1253_v7 = vld [vmem:[%s1318_s15 + $0x188] sm:$0xff] }
 0x3a7   : > { %v764_v14 = vpop.f32.mrf.mxu0  ;;  %v837_v60 = vpop.f32.mrf.mxu1 }
 0x3a8   : > { %v765_v61 = vadd.f32 %v764_v14, %v1442_v45  ;;  %v838_v41 = vadd.f32 %v837_v60, %v1448_v47  ;;  %v1254_v60 = vld [vmem:[%s1318_s15 + $0x198] sm:$0xff] }
 0x3a9   : > { %v766_v15 = vpop.f32.mrf.mxu0  ;;  %v839_v55 = vpop.f32.mrf.mxu1 }
 0x3aa   : > { %1022 = vst [vmem:[%s1769_s19] sm:$0xff] %v765_v61  ;;  %1024 = vst [vmem:[%s1769_s19 + $0x10] sm:$0xff] %v838_v41  ;;  %v767_v21 = vadd.f32 %v766_v15, %v1379_v27  ;;  %v840_v59 = vadd.f32 %v839_v55, %v1385_v29  ;;  %v1255_v55 = vld [vmem:[%s1318_s15 + $0x1c0] sm:$0xff] }
 0x3ab   : > { %v768_v58 = vpop.f32.mrf.mxu0  ;;  %v841_v62 = vpop.f32.mrf.mxu1 }
 0x3ac   : > { %1023 = vst [vmem:[%s1769_s19 + $0x8] sm:$0xff] %v767_v21  ;;  %1025 = vst [vmem:[%s1769_s19 + $0x18] sm:$0xff] %v840_v59  ;;  %v769_v45 = vadd.f32 %v768_v58, %v1445_v46  ;;  %v842_v47 = vadd.f32 %v841_v62, %v1452_v48  ;;  %v1256_v59 = vld [vmem:[%s1318_s15 + $0x1d0] sm:$0xff] }
 0x3ad   : > { %v770_v63 = vpop.f32.mrf.mxu0  ;;  %v843_v16 = vpop.f32.mrf.mxu1 }
 0x3ae   : > { %1030 = vst [vmem:[%s1769_s19 + $0x40] sm:$0xff] %v769_v45  ;;  %1032 = vst [vmem:[%s1769_s19 + $0x50] sm:$0xff] %v842_v47  ;;  %v771_v27 = vadd.f32 %v770_v63, %v1382_v28  ;;  %v844_v29 = vadd.f32 %v843_v16, %v1400_v33  ;;  %v1257_v47 = vld [vmem:[%s1318_s15 + $0x1c8] sm:$0xff]  ;;  %v1258_v16 = vld [vmem:[%s1318_s15 + $0x1d8] sm:$0xff] }
 0x3af   : > { %v774_v44 = vpop.f32.mrf.mxu0  ;;  %v847_v20 = vpop.f32.mrf.mxu1 }
 0x3b0   : > { %1031 = vst [vmem:[%s1769_s19 + $0x48] sm:$0xff] %v771_v27  ;;  %1033 = vst [vmem:[%s1769_s19 + $0x58] sm:$0xff] %v844_v29  ;;  %v775_v46 = vadd.f32 %v774_v44, %v1416_v37  ;;  %v848_v48 = vadd.f32 %v847_v20, %v1423_v39  ;;  %v1967_v20 = vld [vmem:[#allocation17_spill] sm:$0xff] }
 0x3b1   : > { %v776_v9 = vpop.f32.mrf.mxu0  ;;  %v849_v8 = vpop.f32.mrf.mxu1 }
 0x3b2   : > { %1038 = vst [vmem:[%s1769_s19 + $0x80] sm:$0xff] %v775_v46  ;;  %1040 = vst [vmem:[%s1769_s19 + $0x90] sm:$0xff] %v848_v48  ;;  %v777_v28 = vadd.f32 %v776_v9, %v1363_v22  ;;  %v850_v33 = vadd.f32 %v849_v8, %v1369_v24  ;;  %v234_v48 = vsel %vm226_vm0, %v1967_v20, 0.0  ;;  %v1969_v9 = vld [vmem:[#allocation19_spill] sm:$0xff] }
 0x3b3   : > { %v778_v54 = vpop.f32.mrf.mxu0  ;;  %v851_v12 = vpop.f32.mrf.mxu1 }
 0x3b4   : > { %1039 = vst [vmem:[%s1769_s19 + $0x88] sm:$0xff] %v777_v28  ;;  %1041 = vst [vmem:[%s1769_s19 + $0x98] sm:$0xff] %v850_v33  ;;  %v779_v37 = vadd.f32 %v778_v54, %v1419_v38  ;;  %v852_v39 = vadd.f32 %v851_v12, %v1426_v40  ;;  %v1964_v40 = vld [vmem:[#allocation4_spill] sm:$0xff]  ;;  %v1970_v28 = vld [vmem:[#allocation21_spill] sm:$0xff] }
 0x3b5   : > { %v780_v34 = vpop.f32.mrf.mxu0  ;;  %v853_v31 = vpop.f32.mrf.mxu1 }
 0x3b6   : > { %1046 = vst [vmem:[%s1769_s19 + $0xc0] sm:$0xff] %v779_v37  ;;  %1048 = vst [vmem:[%s1769_s19 + $0xd0] sm:$0xff] %v852_v39  ;;  %v781_v22 = vadd.f32 %v780_v34, %v1366_v23  ;;  %v854_v24 = vadd.f32 %v853_v31, %v1372_v25  ;;  %v1247_v23 = vld [vmem:[%s1318_s15 + $0x108] sm:$0xff]  ;;  %v1971_v37 = vld [vmem:[#allocation15_spill] sm:$0xff] }
 0x3b7   : > { %v784_v17 = vpop.f32.mrf.mxu0  ;;  %v857_v49 = vpop.f32.mrf.mxu1 }
 0x3b8   : > { %1047 = vst [vmem:[%s1769_s19 + $0xc8] sm:$0xff] %v781_v22  ;;  %1049 = vst [vmem:[%s1769_s19 + $0xd8] sm:$0xff] %v854_v24  ;;  %v785_v38 = vadd.f32 %v784_v17, %v1349_v18  ;;  %v858_v42 = vadd.f32 %v857_v49, %v1964_v40  ;;  %v1965_v18 = vld [vmem:[#allocation3_spill] sm:$0xff]  ;;  %v1972_v24 = vld [vmem:[#allocation18_spill] sm:$0xff] }
 0x3b9   : > { %v786_v26 = vpop.f32.mrf.mxu0  ;;  %v859_v2 = vpop.f32.mrf.mxu1  ;;  %v242_v17 = vsel %vm226_vm0, %v1972_v24, 0.0  ;;  %v1973_v49 = vld [vmem:[#allocation20_spill] sm:$0xff]  ;;  %v1974_v40 = vld [vmem:[#allocation22_spill] sm:$0xff] }
 0x3ba   : > { %1054 = vst [vmem:[%s1769_s19 + $0x100] sm:$0xff] %v785_v38  ;;  %1056 = vst [vmem:[%s1769_s19 + $0x110] sm:$0xff] %v858_v42  ;;  %v787_v25 = vadd.f32 %v1247_v23, %v786_v26  ;;  %v860_v35 = vadd.f32 %v1248_v30, %v859_v2  ;;  %v1975_v23 = vld [vmem:[#allocation16_spill] sm:$0xff] }
 0x3bb   : > { %v788_v43 = vpop.f32.mrf.mxu0  ;;  %v861_v56 = vpop.f32.mrf.mxu1 }
 0x3bc   : > { %1055 = vst [vmem:[%s1769_s19 + $0x108] sm:$0xff] %v787_v25  ;;  %1057 = vst [vmem:[%s1769_s19 + $0x118] sm:$0xff] %v860_v35  ;;  %v789_v19 = vadd.f32 %v788_v43, %v1965_v18  ;;  %v862_v32 = vadd.f32 %v861_v56, %v1966_v3  ;;  %v1976_v56 = vld [vmem:[#allocation9_spill] sm:$0xff] }
 0x3bd   : > { %v790_v53 = vpop.f32.mrf.mxu0  ;;  %v863_v0 = vpop.f32.mrf.mxu1  ;;  %v250_v18 = vsel %vm226_vm0, %v1976_v56, 0.0 }
 0x3be   : > { %1062 = vst [vmem:[%s1769_s19 + $0x140] sm:$0xff] %v789_v19  ;;  %1064 = vst [vmem:[%s1769_s19 + $0x150] sm:$0xff] %v862_v32  ;;  %v791_v5 = vadd.f32 %v1249_v4, %v790_v53  ;;  %v864_v36 = vadd.f32 %v1250_v6, %v863_v0  ;;  %v1977_v19 = vld [vmem:[#allocation11_spill] sm:$0xff]  ;;  %v1978_v32 = vld [vmem:[#allocation13_spill] sm:$0xff] }
 0x3bf   : > { %v794_v50 = vpop.f32.mrf.mxu0  ;;  %v867_v51 = vpop.f32.mrf.mxu1 }
 0x3c0   : > { %1063 = vst [vmem:[%s1769_s19 + $0x148] sm:$0xff] %v791_v5  ;;  %1065 = vst [vmem:[%s1769_s19 + $0x158] sm:$0xff] %v864_v36  ;;  %v795_v1 = vadd.f32 %v1251_v52, %v794_v50  ;;  %v868_v57 = vadd.f32 %v1252_v10, %v867_v51  ;;  %v1979_v5 = vld [vmem:[#allocation7_spill] sm:$0xff]  ;;  %v1980_v52 = vld [vmem:[#allocation10_spill] sm:$0xff] }
 0x3c1   : > { %v796_v11 = vpop.f32.mrf.mxu0  ;;  %v869_v13 = vpop.f32.mrf.mxu1  ;;  %v1981_v10 = vld [vmem:[#allocation12_spill] sm:$0xff] }
 0x3c2   : > { %1070 = vst [vmem:[%s1769_s19 + $0x180] sm:$0xff] %v795_v1  ;;  %1072 = vst [vmem:[%s1769_s19 + $0x190] sm:$0xff] %v868_v57  ;;  %v797_v14 = vadd.f32 %v1253_v7, %v796_v11  ;;  %v870_v61 = vadd.f32 %v1254_v60, %v869_v13  ;;  %v258_v1 = vsel %vm226_vm0, %v1980_v52, 0.0  ;;  %v1982_v11 = vld [vmem:[#allocation14_spill] sm:$0xff]  ;;  %v1983_v60 = vld [vmem:[#allocation8_spill] sm:$0xff] }
 0x3c3   : > { %v798_v41 = vpop.f32.mrf.mxu0  ;;  %v871_v15 = vpop.f32.mrf.mxu1 }
 0x3c4   : > { %1071 = vst [vmem:[%s1769_s19 + $0x188] sm:$0xff] %v797_v14  ;;  %1073 = vst [vmem:[%s1769_s19 + $0x198] sm:$0xff] %v870_v61  ;;  %v799_v21 = vadd.f32 %v1255_v55, %v798_v41  ;;  %v872_v58 = vadd.f32 %v1256_v59, %v871_v15 }
 0x3c5   : > { %v800_v62 = vpop.f32.mrf.mxu0  ;;  %v873_v45 = vpop.f32.mrf.mxu1 }
 0x3c6   : > { %1078 = vst [vmem:[%s1769_s19 + $0x1c0] sm:$0xff] %v799_v21  ;;  %1080 = vst [vmem:[%s1769_s19 + $0x1d0] sm:$0xff] %v872_v58  ;;  %v801_v63 = vadd.f32 %v1257_v47, %v800_v62  ;;  %v874_v27 = vadd.f32 %v1258_v16, %v873_v45  ;;  %v1259_v21 = vld [vmem:[%s1318_s15 + $0x138] sm:$0xff]  ;;  %v1260_v58 = vld [vmem:[%s1318_s15 + $0x120] sm:$0xff] }
 0x3c7   : > { %v910_v29 = vpop.f32.mrf.mxu0  ;;  %v983_v44 = vpop.f32.mrf.mxu1  ;;  %v266_v59 = vsel %vm226_vm0, %v1259_v21, 0.0  ;;  %v1261_v45 = vld [vmem:[%s1318_s15 + $0x130] sm:$0xff] }
 0x3c8   : > { %1079 = vst [vmem:[%s1769_s19 + $0x1c8] sm:$0xff] %v801_v63  ;;  %1081 = vst [vmem:[%s1769_s19 + $0x1d8] sm:$0xff] %v874_v27  ;;  %v911_v8 = vadd.f32 %v910_v29, %v1969_v9  ;;  %v984_v33 = vadd.f32 %v983_v44, %v1970_v28  ;;  %v1262_v27 = vld [vmem:[%s1318_s15 + $0x128] sm:$0xff]  ;;  %v1263_v9 = vld [vmem:[%s1318_s15 + $0x178] sm:$0xff] }
 0x3c9   : > { %v912_v54 = vpop.f32.mrf.mxu0  ;;  %v985_v12 = vpop.f32.mrf.mxu1  ;;  %v1264_v28 = vld [vmem:[%s1318_s15 + $0x160] sm:$0xff] }
 0x3ca   : > { %1026 = vst [vmem:[%s1769_s19 + $0x20] sm:$0xff] %v911_v8  ;;  %1028 = vst [vmem:[%s1769_s19 + $0x30] sm:$0xff] %v984_v33  ;;  %v913_v39 = vadd.f32 %v912_v54, %v1971_v37  ;;  %v986_v34 = vadd.f32 %v985_v12, %v234_v48  ;;  %v274_v8 = vsel %vm226_vm0, %v1263_v9, 0.0  ;;  %v1265_v54 = vld [vmem:[%s1318_s15 + $0x170] sm:$0xff] }
 0x3cb   : > { %v914_v31 = vpop.f32.mrf.mxu0  ;;  %v987_v22 = vpop.f32.mrf.mxu1 }
 0x3cc   : > { %1027 = vst [vmem:[%s1769_s19 + $0x28] sm:$0xff] %v913_v39  ;;  %1029 = vst [vmem:[%s1769_s19 + $0x38] sm:$0xff] %v986_v34  ;;  %v915_v38 = vadd.f32 %v914_v31, %v1973_v49  ;;  %v988_v42 = vadd.f32 %v987_v22, %v1974_v40  ;;  %v1266_v34 = vld [vmem:[%s1318_s15 + $0x168] sm:$0xff]  ;;  %v1267_v49 = vld [vmem:[%s1318_s15 + $0x1b8] sm:$0xff] }
 0x3cd   : > { %v916_v26 = vpop.f32.mrf.mxu0  ;;  %v989_v2 = vpop.f32.mrf.mxu1  ;;  %v1268_v40 = vld [vmem:[%s1318_s15 + $0x1a0] sm:$0xff] }
 0x3ce   : > { %1034 = vst [vmem:[%s1769_s19 + $0x60] sm:$0xff] %v915_v38  ;;  %1036 = vst [vmem:[%s1769_s19 + $0x70] sm:$0xff] %v988_v42  ;;  %v917_v25 = vadd.f32 %v916_v26, %v1975_v23  ;;  %v990_v30 = vadd.f32 %v989_v2, %v242_v17  ;;  %v282_v38 = vsel %vm226_vm0, %v1267_v49, 0.0  ;;  %v1269_v26 = vld [vmem:[%s1318_s15 + $0x1b0] sm:$0xff] }
 0x3cf   : > { %v920_v35 = vpop.f32.mrf.mxu0  ;;  %v993_v43 = vpop.f32.mrf.mxu1 }
 0x3d0   : > { %1035 = vst [vmem:[%s1769_s19 + $0x68] sm:$0xff] %v917_v25  ;;  %1037 = vst [vmem:[%s1769_s19 + $0x78] sm:$0xff] %v990_v30  ;;  %v921_v3 = vadd.f32 %v920_v35, %v1977_v19  ;;  %v994_v53 = vadd.f32 %v993_v43, %v1978_v32  ;;  %v1270_v30 = vld [vmem:[%s1318_s15 + $0x1a8] sm:$0xff]  ;;  %v1271_v19 = vld [vmem:[%s1318_s15 + $0x1f8] sm:$0xff] }
 0x3d1   : > { %v922_v0 = vpop.f32.mrf.mxu0  ;;  %v995_v4 = vpop.f32.mrf.mxu1  ;;  %v1272_v32 = vld [vmem:[%s1318_s15 + $0x1e0] sm:$0xff] }
 0x3d2   : > { %1042 = vst [vmem:[%s1769_s19 + $0xa0] sm:$0xff] %v921_v3  ;;  %1044 = vst [vmem:[%s1769_s19 + $0xb0] sm:$0xff] %v994_v53  ;;  %v923_v6 = vadd.f32 %v922_v0, %v1979_v5  ;;  %v996_v36 = vadd.f32 %v995_v4, %v250_v18  ;;  %v290_v3 = vsel %vm226_vm0, %v1271_v19, 0.0  ;;  %v1273_v0 = vld [vmem:[%s1318_s15 + $0x1f0] sm:$0xff] }
 0x3d3   : > { %v924_v50 = vpop.f32.mrf.mxu0  ;;  %v997_v51 = vpop.f32.mrf.mxu1 }
 0x3d4   : > { %1043 = vst [vmem:[%s1769_s19 + $0xa8] sm:$0xff] %v923_v6  ;;  %1045 = vst [vmem:[%s1769_s19 + $0xb8] sm:$0xff] %v996_v36  ;;  %v925_v57 = vadd.f32 %v924_v50, %v1981_v10  ;;  %v998_v13 = vadd.f32 %v997_v51, %v1982_v11  ;;  %v1274_v36 = vld [vmem:[%s1318_s15 + $0x1e8] sm:$0xff] }
 0x3d5   : > { %v926_v7 = vpop.f32.mrf.mxu0  ;;  %v999_v14 = vpop.f32.mrf.mxu1 }
 0x3d6   : > { %1050 = vst [vmem:[%s1769_s19 + $0xe0] sm:$0xff] %v925_v57  ;;  %1052 = vst [vmem:[%s1769_s19 + $0xf0] sm:$0xff] %v998_v13  ;;  %v927_v61 = vadd.f32 %v926_v7, %v1983_v60  ;;  %v1000_v41 = vadd.f32 %v999_v14, %v258_v1 }
 0x3d7   : > { %v930_v15 = vpop.f32.mrf.mxu0  ;;  %v1003_v55 = vpop.f32.mrf.mxu1 }
 0x3d8   : > { %1051 = vst [vmem:[%s1769_s19 + $0xe8] sm:$0xff] %v927_v61  ;;  %1053 = vst [vmem:[%s1769_s19 + $0xf8] sm:$0xff] %v1000_v41  ;;  %v931_v62 = vadd.f32 %v1260_v58, %v930_v15  ;;  %v1004_v47 = vadd.f32 %v1261_v45, %v1003_v55 }
 0x3d9   : > { %v932_v63 = vpop.f32.mrf.mxu0  ;;  %v1005_v16 = vpop.f32.mrf.mxu1 }
 0x3da   : > { %1058 = vst [vmem:[%s1769_s19 + $0x120] sm:$0xff] %v931_v62  ;;  %1060 = vst [vmem:[%s1769_s19 + $0x130] sm:$0xff] %v1004_v47  ;;  %v933_v29 = vadd.f32 %v1262_v27, %v932_v63  ;;  %v1006_v44 = vadd.f32 %v1005_v16, %v266_v59 }
 0x3db   : > { %v934_v20 = vpop.f32.mrf.mxu0  ;;  %v1007_v48 = vpop.f32.mrf.mxu1 }
 0x3dc   : > { %1059 = vst [vmem:[%s1769_s19 + $0x128] sm:$0xff] %v933_v29  ;;  %1061 = vst [vmem:[%s1769_s19 + $0x138] sm:$0xff] %v1006_v44  ;;  %v935_v33 = vadd.f32 %v1264_v28, %v934_v20  ;;  %v1008_v12 = vadd.f32 %v1265_v54, %v1007_v48 }
 0x3dd   : > { %v936_v37 = vpop.f32.mrf.mxu0  ;;  %v1009_v39 = vpop.f32.mrf.mxu1 }
 0x3de   : > { %1066 = vst [vmem:[%s1769_s19 + $0x160] sm:$0xff] %v935_v33  ;;  %1068 = vst [vmem:[%s1769_s19 + $0x170] sm:$0xff] %v1008_v12  ;;  %v937_v31 = vadd.f32 %v1266_v34, %v936_v37  ;;  %v1010_v22 = vadd.f32 %v1009_v39, %v274_v8 }
 0x3df   : > { %v940_v24 = vpop.f32.mrf.mxu0  ;;  %v1013_v17 = vpop.f32.mrf.mxu1 }
 0x3e0   : > { %1067 = vst [vmem:[%s1769_s19 + $0x168] sm:$0xff] %v937_v31  ;;  %1069 = vst [vmem:[%s1769_s19 + $0x178] sm:$0xff] %v1010_v22  ;;  %v941_v42 = vadd.f32 %v1268_v40, %v940_v24  ;;  %v1014_v2 = vadd.f32 %v1269_v26, %v1013_v17 }
 0x3e1   : > { %v942_v23 = vpop.f32.mrf.mxu0  ;;  %v1015_v25 = vpop.f32.mrf.mxu1 }
 0x3e2   : > { %1074 = vst [vmem:[%s1769_s19 + $0x1a0] sm:$0xff] %v941_v42  ;;  %1076 = vst [vmem:[%s1769_s19 + $0x1b0] sm:$0xff] %v1014_v2  ;;  %v943_v35 = vadd.f32 %v1270_v30, %v942_v23  ;;  %v1016_v43 = vadd.f32 %v1015_v25, %v282_v38 }
 0x3e3   : > { %v944_v56 = vpop.f32.mrf.mxu0  ;;  %v1017_v18 = vpop.f32.mrf.mxu1 }
 0x3e4   : > { %1075 = vst [vmem:[%s1769_s19 + $0x1a8] sm:$0xff] %v943_v35  ;;  %1077 = vst [vmem:[%s1769_s19 + $0x1b8] sm:$0xff] %v1016_v43  ;;  %v945_v53 = vadd.f32 %v1272_v32, %v944_v56  ;;  %v1018_v4 = vadd.f32 %v1273_v0, %v1017_v18 }
 0x3e5   : > { %v946_v5 = vpop.f32.mrf.mxu0  ;;  %v1019_v6 = vpop.f32.mrf.mxu1 }
 0x3e6   : > { %1082 = vst [vmem:[%s1769_s19 + $0x1e0] sm:$0xff] %v945_v53  ;;  %1084 = vst [vmem:[%s1769_s19 + $0x1f0] sm:$0xff] %v1018_v4  ;;  %v947_v50 = vadd.f32 %v1274_v36, %v946_v5  ;;  %v1020_v51 = vadd.f32 %v1019_v6, %v290_v3 }
 0x3e8   : > { %1083 = vst [vmem:[%s1769_s19 + $0x1e8] sm:$0xff] %v947_v50  ;;  %1085 = vst [vmem:[%s1769_s19 + $0x1f8] sm:$0xff] %v1020_v51 }
 0x3e9 PF: > { %s13_s11 = sadd.s32 1, %s1281_s11  }
 0x3ea   : > { %p10_p4 = scmp.ge.s32.totalorder %s13_s11, 4  }
 0x3ec   :  { %12 = sbr.rel (!%p10_p4) target bundleno = 2 (0x2), region = 58 }

</bundles_post_ra>
